<compile_context>
chip_gen: v5e
topology: v5e:2x2
jax: 0.10.0
libtpu: 0.0.40
codegen_flags: <defaults>
</compile_context>

<pallas_src>
import functools

import jax
import jax.numpy as jnp
from jax.experimental import pallas as pl
from jax.experimental.pallas import tpu as pltpu

_LANE = 128      # lane width (last-dim granule)
_SUBLANE = 8     # f32 sublane granule (second-to-last dim)


def _round_up(x, m):
    return (x + m - 1) // m * m


# --------------------------------------------------------------------------
# Kernel
# --------------------------------------------------------------------------
def _fused_mlp_kernel(*refs, n_layers: int, scale: float):
    """refs = (x_ref, w0, b0, w1, b1, ..., o_ref).

    o = scale * relu(...relu(relu(x @ W0 + b0) @ W1 + b1)...)
    The whole layer chain runs on one (tm, D_pad) activation tile held in
    VMEM/vregs; intermediates never touch HBM.  Weights are bf16 (MXU-native),
    accumulation / bias / ReLU / scale are f32.
    """
    x_ref = refs[0]
    o_ref = refs[-1]
    wb_refs = refs[1:-1]

    x = x_ref[...]                                       # (tm, d0_pad) f32
    for k in range(n_layers):
        w = wb_refs[2 * k][...]                          # (dk_pad, dk1_pad) bf16
        b = wb_refs[2 * k + 1][...]                      # (1, dk1_pad)     f32
        acc = jnp.dot(x.astype(jnp.bfloat16), w,
                      preferred_element_type=jnp.float32)
        x = jnp.maximum(acc + b, 0.0)                    # bias + ReLU in f32
    if scale != 1.0:                                     # only when scale <= 0
        x = scale * x
    o_ref[...] = x.astype(o_ref.dtype)


# --------------------------------------------------------------------------
# Parameter preparation (done ONCE, not per forward call)
# --------------------------------------------------------------------------
def prepare_mlp_params(params, scaling_factor=1.0):
    """Pad / fold / cast parameters once.

    params: list of (w, b) with w: (d_in_k, d_out_k), b: (d_out_k,)
    scaling_factor must be a static Python float.
    """
    scaling_factor = float(scaling_factor)
    n_layers = len(params)
    dims = [params[0][0].shape[0]] + [w.shape[1] for (w, _) in params]
    dims_pad = [_round_up(d, _LANE) for d in dims]

    # Fold the final Scale into the last layer when scale > 0 (valid since
    # scale*relu(z) == relu(scale*z) for scale > 0); else keep in-kernel mul.
    params = list(params)
    if scaling_factor > 0:
        w_last, b_last = params[-1]
        params[-1] = (w_last * scaling_factor, b_last * scaling_factor)
        kern_scale = 1.0
    else:
        kern_scale = scaling_factor

    # Zero-pad to lane-dense shapes; weights in bf16, biases in f32.  Padded
    # cols / bias entries are 0 so padded lanes stay exactly 0 through ReLU.
    padded = []
    for k, (w, b) in enumerate(params):
        di, do = w.shape
        dpi, dpo = dims_pad[k], dims_pad[k + 1]
        wp = (jnp.zeros((dpi, dpo), jnp.float32)
              .at[:di, :do].set(w.astype(jnp.float32))
              .astype(jnp.bfloat16))
        bp = (jnp.zeros((1, dpo), jnp.float32)
              .at[0, :do].set(b.reshape(-1).astype(jnp.float32)))
        padded.append((wp, bp))

    return dict(padded=padded, dims=dims, dims_pad=dims_pad,
                n_layers=n_layers, kern_scale=kern_scale,
                scaling_factor=scaling_factor)


# --------------------------------------------------------------------------
# Forward
# --------------------------------------------------------------------------
def mlp_forward(z, prepared):
    """Equivalent of MLP.forward.  z: (m, d_in) f32."""
    m, d_in0 = z.shape
    dims, dims_pad = prepared["dims"], prepared["dims_pad"]
    n_layers = prepared["n_layers"]
    assert d_in0 == dims[0], "input feature dim mismatch"

    # scale == 0  ->  output is exactly zero, skip the kernel launch.
    if prepared["scaling_factor"] == 0.0:
        return jnp.zeros((m, dims[-1]), jnp.float32)

    # ---- batch tiling -----------------------------------------------------
    if m >= 256:
        tm = 256                      # full M side of the 2x256x256 MXU (v6e/v7x)
    elif m >= _LANE:
        tm = _LANE
    else:
        tm = _round_up(m, _SUBLANE)
    m_pad = _round_up(m, tm)
    # Keep both v7x TensorCores busy: split the "parallel" batch axis when a
    # single tile would cover the whole (splittable) batch.
    if m_pad // tm == 1 and m > _SUBLANE:
        tm = _round_up(-(-m // 2), _SUBLANE)
        m_pad = _round_up(m, tm)
    grid = (m_pad // tm,)

    zp = (jnp.zeros((m_pad, dims_pad[0]), jnp.float32)
          .at[:m, :d_in0].set(z.astype(jnp.float32)))

    # ---- VMEM budget (generation aware) ------------------------------------
    weight_bytes = sum(dims_pad[k] * dims_pad[k + 1] * 2 + dims_pad[k + 1] * 4
                       for k in range(n_layers))
    act_bytes = tm * dims_pad[0] * 4 + tm * dims_pad[-1] * 4
    vmem_need = 2 * weight_bytes + 2 * act_bytes + (4 << 20)   # headroom
    try:
        phys_vmem = pltpu.get_tpu_info().vmem_capacity_bytes
    except Exception:
        phys_vmem = 64 << 20          # conservative (v7x-sized) default
    vmem_limit = int(min(max(vmem_need, 32 << 20),
                         max(phys_vmem - (8 << 20), 16 << 20)))

    # ---- cost estimate from TRUE (unpadded) dims ----------------------------
    flops = 2 * m * sum(dims[k] * dims[k + 1] for k in range(n_layers))
    bytes_accessed = (4 * (m * dims[0] + m * dims[-1])
                      + sum(2 * dims[k] * dims[k + 1] + 4 * dims[k + 1]
                            for k in range(n_layers)))

    kernel = functools.partial(_fused_mlp_kernel, n_layers=n_layers,
                               scale=prepared["kern_scale"])
    out_shape = jax.ShapeDtypeStruct((m_pad, dims_pad[-1]), jnp.float32)
    out_spec = pl.BlockSpec((tm, dims_pad[-1]), lambda i: (i, 0))

    def _build_in_specs(single_buffer_weights):
        in_specs = [pl.BlockSpec((tm, dims_pad[0]), lambda i: (i, 0))]
        flat_inputs = [zp]
        for k, (wp, bp) in enumerate(prepared["padded"]):
            w_shape = (dims_pad[k], dims_pad[k + 1])
            b_shape = (1, dims_pad[k + 1])
            if single_buffer_weights:
                # Constant index_map => resident across grid steps; single
                # buffering halves their VMEM footprint.
                w_spec = pl.BlockSpec(w_shape, lambda i: (0, 0),
                                      pipeline_mode=pl.Buffered(1))
                b_spec = pl.BlockSpec(b_shape, lambda i: (0, 0),
                                      pipeline_mode=pl.Buffered(1))
            else:
                w_spec = pl.BlockSpec(w_shape, lambda i: (0, 0))
                b_spec = pl.BlockSpec(b_shape, lambda i: (0, 0))
            in_specs += [w_spec, b_spec]
            flat_inputs += [wp, bp]
        return in_specs, flat_inputs

    def _run(single_buffer_weights):
        in_specs, flat_inputs = _build_in_specs(single_buffer_weights)
        return pl.pallas_call(
            kernel,
            out_shape=out_shape,
            grid=grid,
            in_specs=in_specs,
            out_specs=out_spec,
            compiler_params=pltpu.CompilerParams(
                dimension_semantics=("parallel",),   # 2-TC sharding on v7x
                vmem_limit_bytes=vmem_limit),
            cost_estimate=pl.CostEstimate(
                flops=flops, transcendentals=0,
                bytes_accessed=bytes_accessed),
        )(*flat_inputs)

    try:
        out = _run(True)
    except Exception:
        # Fallback: default (double-buffered) weight pipelining.
        out = _run(False)

    # Slice padded rows / lanes back to the true output shape.
    return out[:m, :dims[-1]]


# --------------------------------------------------------------------------
# Init (PyTorch nn.Linear-style: U(-1/sqrt(fan_in), 1/sqrt(fan_in)))
# --------------------------------------------------------------------------
def init_mlp_params(key, features_dim_list):
    params = []
    for k in range(len(features_dim_list) - 1):
        d_in, d_out = features_dim_list[k], features_dim_list[k + 1]
        key, wk, bk = jax.random.split(key, 3)
        bound = 1.0 / (d_in ** 0.5)
        w = jax.random.uniform(wk, (d_in, d_out), jnp.float32, -bound, bound)
        b = jax.random.uniform(bk, (d_out,), jnp.float32, -bound, bound)
        params.append((w, b))
    return params


if __name__ == "__main__":
    # Mirrors MLP(features_dim_list, activation_layer=nn.ReLU(), scaling_factor)
    features_dim_list = [16, 32, 32, 8]
    scaling_factor = 0.5
    batch = 8

    key = jax.random.PRNGKey(0)
    key, zk = jax.random.split(key)
    z = jax.random.normal(zk, (batch, features_dim_list[0]), jnp.float32)

    params = init_mlp_params(key, features_dim_list)
    prepared = prepare_mlp_params(params, scaling_factor=scaling_factor)

    out = mlp_forward(z, prepared)
    out = jax.block_until_ready(out)
    assert out.shape == (batch, features_dim_list[-1])

    # Reference 1: module semantics in pure f32 (loose tol: kernel uses bf16
    # MXU operands with f32 accumulation).
    ref_f32 = z
    for (w, b) in params:
        ref_f32 = jnp.maximum(ref_f32 @ w + b, 0.0)
    ref_f32 = scaling_factor * ref_f32
    assert jnp.allclose(out, ref_f32, atol=5e-2, rtol=5e-2)

    # Reference 2: same bf16-operand / f32-accumulate math as the kernel
    # (including the scale fold into the last layer) -- tight tolerance.
    n_layers = len(params)
    ref_bf = z
    for k, (w, b) in enumerate(params):
        wf, bf = w, b
        if k == n_layers - 1 and scaling_factor > 0:
            wf, bf = w * scaling_factor, b * scaling_factor
        acc = jnp.dot(ref_bf.astype(jnp.bfloat16), wf.astype(jnp.bfloat16),
                      preferred_element_type=jnp.float32)
        ref_bf = jnp.maximum(acc + bf.astype(jnp.float32), 0.0)
    if scaling_factor <= 0:
        ref_bf = scaling_factor * ref_bf
    assert jnp.allclose(out, ref_bf, atol=1e-3, rtol=1e-3)

    print("KERNEL_OK")
</pallas_src>

<mosaic_0001>
module attributes {stable_mosaic.version = 11 : i64} {
  func.func @_fused_mlp_kernel(%arg0: i32, %arg1: memref<8x128xf32, #tpu.memory_space<vmem>>, %arg2: memref<128x128xbf16, #tpu.memory_space<vmem>>, %arg3: memref<1x128xf32, #tpu.memory_space<vmem>>, %arg4: memref<128x128xbf16, #tpu.memory_space<vmem>>, %arg5: memref<1x128xf32, #tpu.memory_space<vmem>>, %arg6: memref<128x128xbf16, #tpu.memory_space<vmem>>, %arg7: memref<1x128xf32, #tpu.memory_space<vmem>>, %arg8: memref<8x128xf32, #tpu.memory_space<vmem>>) attributes {dimension_semantics = [#tpu.dimension_semantics<parallel>], iteration_bounds = array<i64: 1>, scalar_prefetch = 0 : i64, scratch_operands = 0 : i64, tpu.core_type = #tpu.core_type<tc>, window_params = [{transform_indices = @transform_0, window_bounds = array<i64: 8, 128>}, {pipeline_mode = #tpu.pipeline_mode<synchronous>, transform_indices = @transform_1, window_bounds = array<i64: 128, 128>}, {pipeline_mode = #tpu.pipeline_mode<synchronous>, transform_indices = @transform_2, window_bounds = array<i64: 1, 128>}, {pipeline_mode = #tpu.pipeline_mode<synchronous>, transform_indices = @transform_3, window_bounds = array<i64: 128, 128>}, {pipeline_mode = #tpu.pipeline_mode<synchronous>, transform_indices = @transform_4, window_bounds = array<i64: 1, 128>}, {pipeline_mode = #tpu.pipeline_mode<synchronous>, transform_indices = @transform_5, window_bounds = array<i64: 128, 128>}, {pipeline_mode = #tpu.pipeline_mode<synchronous>, transform_indices = @transform_6, window_bounds = array<i64: 1, 128>}, {transform_indices = @transform_7, window_bounds = array<i64: 8, 128>}]} {
    %c0 = arith.constant 0 : index
    %c0_0 = arith.constant 0 : index
    %0 = vector.load %arg1[%c0, %c0_0] : memref<8x128xf32, #tpu.memory_space<vmem>>, vector<8x128xf32>
    %c0_1 = arith.constant 0 : index
    %c0_2 = arith.constant 0 : index
    %1 = vector.load %arg2[%c0_1, %c0_2] : memref<128x128xbf16, #tpu.memory_space<vmem>>, vector<128x128xbf16>
    %c0_3 = arith.constant 0 : index
    %c0_4 = arith.constant 0 : index
    %2 = vector.load %arg3[%c0_3, %c0_4] : memref<1x128xf32, #tpu.memory_space<vmem>>, vector<1x128xf32>
    %3 = arith.truncf %0 : vector<8x128xf32> to vector<8x128xbf16>
    %cst = arith.constant dense<0.000000e+00> : vector<8x128xf32>
    %4 = tpu.matmul %3, %1, %cst {dimension_numbers = #tpu.dot_dimension_numbers<[1], [0], [0], [1], [0, 0, 1, 1], [], []>} : vector<8x128xbf16>, vector<128x128xbf16>, vector<8x128xf32> -> vector<8x128xf32>
    %5 = vector.broadcast %2 : vector<1x128xf32> to vector<8x128xf32>
    %6 = arith.addf %4, %5 : vector<8x128xf32>
    %cst_5 = arith.constant 0.000000e+00 : f32
    %7 = vector.broadcast %cst_5 : f32 to vector<8x128xf32>
    %8 = arith.maximumf %6, %7 : vector<8x128xf32>
    %c0_6 = arith.constant 0 : index
    %c0_7 = arith.constant 0 : index
    %9 = vector.load %arg4[%c0_6, %c0_7] : memref<128x128xbf16, #tpu.memory_space<vmem>>, vector<128x128xbf16>
    %c0_8 = arith.constant 0 : index
    %c0_9 = arith.constant 0 : index
    %10 = vector.load %arg5[%c0_8, %c0_9] : memref<1x128xf32, #tpu.memory_space<vmem>>, vector<1x128xf32>
    %11 = arith.truncf %8 : vector<8x128xf32> to vector<8x128xbf16>
    %cst_10 = arith.constant dense<0.000000e+00> : vector<8x128xf32>
    %12 = tpu.matmul %11, %9, %cst_10 {dimension_numbers = #tpu.dot_dimension_numbers<[1], [0], [0], [1], [0, 0, 1, 1], [], []>} : vector<8x128xbf16>, vector<128x128xbf16>, vector<8x128xf32> -> vector<8x128xf32>
    %13 = vector.broadcast %10 : vector<1x128xf32> to vector<8x128xf32>
    %14 = arith.addf %12, %13 : vector<8x128xf32>
    %cst_11 = arith.constant 0.000000e+00 : f32
    %15 = vector.broadcast %cst_11 : f32 to vector<8x128xf32>
    %16 = arith.maximumf %14, %15 : vector<8x128xf32>
    %c0_12 = arith.constant 0 : index
    %c0_13 = arith.constant 0 : index
    %17 = vector.load %arg6[%c0_12, %c0_13] : memref<128x128xbf16, #tpu.memory_space<vmem>>, vector<128x128xbf16>
    %c0_14 = arith.constant 0 : index
    %c0_15 = arith.constant 0 : index
    %18 = vector.load %arg7[%c0_14, %c0_15] : memref<1x128xf32, #tpu.memory_space<vmem>>, vector<1x128xf32>
    %19 = arith.truncf %16 : vector<8x128xf32> to vector<8x128xbf16>
    %cst_16 = arith.constant dense<0.000000e+00> : vector<8x128xf32>
    %20 = tpu.matmul %19, %17, %cst_16 {dimension_numbers = #tpu.dot_dimension_numbers<[1], [0], [0], [1], [0, 0, 1, 1], [], []>} : vector<8x128xbf16>, vector<128x128xbf16>, vector<8x128xf32> -> vector<8x128xf32>
    %21 = vector.broadcast %18 : vector<1x128xf32> to vector<8x128xf32>
    %22 = arith.addf %20, %21 : vector<8x128xf32>
    %cst_17 = arith.constant 0.000000e+00 : f32
    %23 = vector.broadcast %cst_17 : f32 to vector<8x128xf32>
    %24 = arith.maximumf %22, %23 : vector<8x128xf32>
    %c0_18 = arith.constant 0 : index
    %c0_19 = arith.constant 0 : index
    %25 = vector.load %arg8[%c0_18, %c0_19] : memref<8x128xf32, #tpu.memory_space<vmem>>, vector<8x128xf32>
    tpu.vector_store %arg8[%c0_18, %c0_19], %24 {strides = array<i32>} : memref<8x128xf32, #tpu.memory_space<vmem>>, vector<8x128xf32>,
    return
  }
  func.func @transform_0(%arg0: i32) -> (i32, i32) {
    %c0_i32 = arith.constant 0 : i32
    %c0_i32_0 = arith.constant 0 : i32
    return %arg0, %c0_i32 : i32, i32
  }
  func.func @transform_1(%arg0: i32) -> (i32, i32) {
    %c0_i32 = arith.constant 0 : i32
    %c0_i32_0 = arith.constant 0 : i32
    %c0_i32_1 = arith.constant 0 : i32
    return %c0_i32, %c0_i32_0 : i32, i32
  }
  func.func @transform_2(%arg0: i32) -> (i32, i32) {
    %c0_i32 = arith.constant 0 : i32
    %c0_i32_0 = arith.constant 0 : i32
    %c0_i32_1 = arith.constant 0 : i32
    return %c0_i32, %c0_i32_0 : i32, i32
  }
  func.func @transform_3(%arg0: i32) -> (i32, i32) {
    %c0_i32 = arith.constant 0 : i32
    %c0_i32_0 = arith.constant 0 : i32
    %c0_i32_1 = arith.constant 0 : i32
    return %c0_i32, %c0_i32_0 : i32, i32
  }
  func.func @transform_4(%arg0: i32) -> (i32, i32) {
    %c0_i32 = arith.constant 0 : i32
    %c0_i32_0 = arith.constant 0 : i32
    %c0_i32_1 = arith.constant 0 : i32
    return %c0_i32, %c0_i32_0 : i32, i32
  }
  func.func @transform_5(%arg0: i32) -> (i32, i32) {
    %c0_i32 = arith.constant 0 : i32
    %c0_i32_0 = arith.constant 0 : i32
    %c0_i32_1 = arith.constant 0 : i32
    return %c0_i32, %c0_i32_0 : i32, i32
  }
  func.func @transform_6(%arg0: i32) -> (i32, i32) {
    %c0_i32 = arith.constant 0 : i32
    %c0_i32_0 = arith.constant 0 : i32
    %c0_i32_1 = arith.constant 0 : i32
    return %c0_i32, %c0_i32_0 : i32, i32
  }
  func.func @transform_7(%arg0: i32) -> (i32, i32) {
    %c0_i32 = arith.constant 0 : i32
    %c0_i32_0 = arith.constant 0 : i32
    return %arg0, %c0_i32 : i32, i32
  }
}

module attributes {stable_mosaic.version = 11 : i64} {
  func.func @_fused_mlp_kernel(%arg0: i32, %arg1: memref<8x128xf32, #tpu.memory_space<vmem>>, %arg2: memref<128x128xbf16, #tpu.memory_space<vmem>>, %arg3: memref<1x128xf32, #tpu.memory_space<vmem>>, %arg4: memref<128x128xbf16, #tpu.memory_space<vmem>>, %arg5: memref<1x128xf32, #tpu.memory_space<vmem>>, %arg6: memref<128x128xbf16, #tpu.memory_space<vmem>>, %arg7: memref<1x128xf32, #tpu.memory_space<vmem>>, %arg8: memref<8x128xf32, #tpu.memory_space<vmem>>) attributes {dimension_semantics = [#tpu.dimension_semantics<parallel>], iteration_bounds = array<i64: 1>, scalar_prefetch = 0 : i64, scratch_operands = 0 : i64, tpu.core_type = #tpu.core_type<tc>, window_params = [{transform_indices = @transform_0, window_bounds = array<i64: 8, 128>}, {pipeline_mode = #tpu.pipeline_mode<synchronous>, transform_indices = @transform_1, window_bounds = array<i64: 128, 128>}, {pipeline_mode = #tpu.pipeline_mode<synchronous>, transform_indices = @transform_2, window_bounds = array<i64: 1, 128>}, {pipeline_mode = #tpu.pipeline_mode<synchronous>, transform_indices = @transform_3, window_bounds = array<i64: 128, 128>}, {pipeline_mode = #tpu.pipeline_mode<synchronous>, transform_indices = @transform_4, window_bounds = array<i64: 1, 128>}, {pipeline_mode = #tpu.pipeline_mode<synchronous>, transform_indices = @transform_5, window_bounds = array<i64: 128, 128>}, {pipeline_mode = #tpu.pipeline_mode<synchronous>, transform_indices = @transform_6, window_bounds = array<i64: 1, 128>}, {transform_indices = @transform_7, window_bounds = array<i64: 8, 128>}]} {
    %c0 = arith.constant 0 : index
    %c0_0 = arith.constant 0 : index
    %0 = vector.load %arg1[%c0, %c0_0] : memref<8x128xf32, #tpu.memory_space<vmem>>, vector<8x128xf32>
    %c0_1 = arith.constant 0 : index
    %c0_2 = arith.constant 0 : index
    %1 = vector.load %arg2[%c0_1, %c0_2] : memref<128x128xbf16, #tpu.memory_space<vmem>>, vector<128x128xbf16>
    %c0_3 = arith.constant 0 : index
    %c0_4 = arith.constant 0 : index
    %2 = vector.load %arg3[%c0_3, %c0_4] : memref<1x128xf32, #tpu.memory_space<vmem>>, vector<1x128xf32>
    %3 = arith.truncf %0 : vector<8x128xf32> to vector<8x128xbf16>
    %cst = arith.constant dense<0.000000e+00> : vector<8x128xf32>
    %4 = tpu.matmul %3, %1, %cst {dimension_numbers = #tpu.dot_dimension_numbers<[1], [0], [0], [1], [0, 0, 1, 1], [], []>} : vector<8x128xbf16>, vector<128x128xbf16>, vector<8x128xf32> -> vector<8x128xf32>
    %5 = vector.broadcast %2 : vector<1x128xf32> to vector<8x128xf32>
    %6 = arith.addf %4, %5 : vector<8x128xf32>
    %cst_5 = arith.constant 0.000000e+00 : f32
    %7 = vector.broadcast %cst_5 : f32 to vector<8x128xf32>
    %8 = arith.maximumf %6, %7 : vector<8x128xf32>
    %c0_6 = arith.constant 0 : index
    %c0_7 = arith.constant 0 : index
    %9 = vector.load %arg4[%c0_6, %c0_7] : memref<128x128xbf16, #tpu.memory_space<vmem>>, vector<128x128xbf16>
    %c0_8 = arith.constant 0 : index
    %c0_9 = arith.constant 0 : index
    %10 = vector.load %arg5[%c0_8, %c0_9] : memref<1x128xf32, #tpu.memory_space<vmem>>, vector<1x128xf32>
    %11 = arith.truncf %8 : vector<8x128xf32> to vector<8x128xbf16>
    %cst_10 = arith.constant dense<0.000000e+00> : vector<8x128xf32>
    %12 = tpu.matmul %11, %9, %cst_10 {dimension_numbers = #tpu.dot_dimension_numbers<[1], [0], [0], [1], [0, 0, 1, 1], [], []>} : vector<8x128xbf16>, vector<128x128xbf16>, vector<8x128xf32> -> vector<8x128xf32>
    %13 = vector.broadcast %10 : vector<1x128xf32> to vector<8x128xf32>
    %14 = arith.addf %12, %13 : vector<8x128xf32>
    %cst_11 = arith.constant 0.000000e+00 : f32
    %15 = vector.broadcast %cst_11 : f32 to vector<8x128xf32>
    %16 = arith.maximumf %14, %15 : vector<8x128xf32>
    %c0_12 = arith.constant 0 : index
    %c0_13 = arith.constant 0 : index
    %17 = vector.load %arg6[%c0_12, %c0_13] : memref<128x128xbf16, #tpu.memory_space<vmem>>, vector<128x128xbf16>
    %c0_14 = arith.constant 0 : index
    %c0_15 = arith.constant 0 : index
    %18 = vector.load %arg7[%c0_14, %c0_15] : memref<1x128xf32, #tpu.memory_space<vmem>>, vector<1x128xf32>
    %19 = arith.truncf %16 : vector<8x128xf32> to vector<8x128xbf16>
    %cst_16 = arith.constant dense<0.000000e+00> : vector<8x128xf32>
    %20 = tpu.matmul %19, %17, %cst_16 {dimension_numbers = #tpu.dot_dimension_numbers<[1], [0], [0], [1], [0, 0, 1, 1], [], []>} : vector<8x128xbf16>, vector<128x128xbf16>, vector<8x128xf32> -> vector<8x128xf32>
    %21 = vector.broadcast %18 : vector<1x128xf32> to vector<8x128xf32>
    %22 = arith.addf %20, %21 : vector<8x128xf32>
    %cst_17 = arith.constant 0.000000e+00 : f32
    %23 = vector.broadcast %cst_17 : f32 to vector<8x128xf32>
    %24 = arith.maximumf %22, %23 : vector<8x128xf32>
    %c0_18 = arith.constant 0 : index
    %c0_19 = arith.constant 0 : index
    %25 = vector.load %arg8[%c0_18, %c0_19] : memref<8x128xf32, #tpu.memory_space<vmem>>, vector<8x128xf32>
    tpu.vector_store %arg8[%c0_18, %c0_19], %24 {strides = array<i32>} : memref<8x128xf32, #tpu.memory_space<vmem>>, vector<8x128xf32>,
    return
  }
  func.func @transform_0(%arg0: i32) -> (i32, i32) {
    %c0_i32 = arith.constant 0 : i32
    %c0_i32_0 = arith.constant 0 : i32
    return %arg0, %c0_i32 : i32, i32
  }
  func.func @transform_1(%arg0: i32) -> (i32, i32) {
    %c0_i32 = arith.constant 0 : i32
    %c0_i32_0 = arith.constant 0 : i32
    %c0_i32_1 = arith.constant 0 : i32
    return %c0_i32, %c0_i32_0 : i32, i32
  }
  func.func @transform_2(%arg0: i32) -> (i32, i32) {
    %c0_i32 = arith.constant 0 : i32
    %c0_i32_0 = arith.constant 0 : i32
    %c0_i32_1 = arith.constant 0 : i32
    return %c0_i32, %c0_i32_0 : i32, i32
  }
  func.func @transform_3(%arg0: i32) -> (i32, i32) {
    %c0_i32 = arith.constant 0 : i32
    %c0_i32_0 = arith.constant 0 : i32
    %c0_i32_1 = arith.constant 0 : i32
    return %c0_i32, %c0_i32_0 : i32, i32
  }
  func.func @transform_4(%arg0: i32) -> (i32, i32) {
    %c0_i32 = arith.constant 0 : i32
    %c0_i32_0 = arith.constant 0 : i32
    %c0_i32_1 = arith.constant 0 : i32
    return %c0_i32, %c0_i32_0 : i32, i32
  }
  func.func @transform_5(%arg0: i32) -> (i32, i32) {
    %c0_i32 = arith.constant 0 : i32
    %c0_i32_0 = arith.constant 0 : i32
    %c0_i32_1 = arith.constant 0 : i32
    return %c0_i32, %c0_i32_0 : i32, i32
  }
  func.func @transform_6(%arg0: i32) -> (i32, i32) {
    %c0_i32 = arith.constant 0 : i32
    %c0_i32_0 = arith.constant 0 : i32
    %c0_i32_1 = arith.constant 0 : i32
    return %c0_i32, %c0_i32_0 : i32, i32
  }
  func.func @transform_7(%arg0: i32) -> (i32, i32) {
    %c0_i32 = arith.constant 0 : i32
    %c0_i32_0 = arith.constant 0 : i32
    return %arg0, %c0_i32 : i32, i32
  }
}

</mosaic_0001>

<bundles_post_ra>
// kernel: tpu_custom_call.1
= control target key start
LH: loop header
LB: loop body
LE: loop exit
PB: predicated region body
PF: predicated region fallthrough
CT: control target
= control target key end

     0   :  { %12 = vsyncpa [#allocation3], 0  ;;  %s687_s0 = inlined_call_operand.hbm [shape: f32[8,128], index: 0, kind: input, shape index: {}]   ;;  %s688_s1 = inlined_call_operand.hbm [shape: bf16[128,128], index: 1, kind: input, shape index: {}]   ;;  %s689_s2 = inlined_call_operand.vmem [shape: f32[1,128], index: 2, kind: input, shape index: {}]   ;;  %s690_s3 = inlined_call_operand.hbm [shape: bf16[128,128], index: 3, kind: input, shape index: {}]   ;;  %s691_s4 = inlined_call_operand.vmem [shape: f32[1,128], index: 4, kind: input, shape index: {}]   ;;  %s692_s5 = inlined_call_operand.hbm [shape: bf16[128,128], index: 5, kind: input, shape index: {}]   ;;  %s693_s6 = inlined_call_operand.vmem [shape: f32[1,128], index: 6, kind: input, shape index: {}]   ;;  %s694_s7 = inlined_call_operand.hbm [shape: f32[8,128], index: 7, kind: output, shape index: {}]  }
   0x1   :  { %13 = vsyncpa [#allocation6], 0 }
   0x2   :  { %14 = vsyncpa [#allocation9], 0  ;;  %s31_s26 = sshll.u32 %s688_s1, 4  ;;  %s32_s26 = int_to_ptr.hbm [resolvable:$true] %s31_s26 }
   0x3   :  { %15 = vsyncpa [#allocation4], 0  ;;  %s616_s27 = smov [#allocation5]   ;;  %s21_s8 = sshll.u32 %s687_s0, 4  ;;  %s22_s8 = int_to_ptr.hbm [resolvable:$true] %s21_s8 }
   0x4   :  { %s33_s28 = sshll.u32 %s616_s27, 4  ;;  %s617_s9 = smov 64   ;;  %s34_s28 = int_to_ptr.vmem [resolvable:$true] %s33_s28 }
   0x5   :  { %s618_s10 = smov 4   ;;  %s619_s11 = smov [#allocation2]  }
   0x6   :  { %39 = dma.hbm_to_vmem [thread:$0]  %s32_s26, 1024, %s34_s28, [#allocation6], %s617_s9, %s617_s9, %s618_s10  }
   0x7   :  { %s23_s12 = sshll.u32 %s619_s11, 4  ;;  %s46_s15 = sshll.u32 %s690_s3, 4  ;;  %s24_s12 = int_to_ptr.vmem [resolvable:$true] %s23_s12  ;;  %s47_s15 = int_to_ptr.hbm [resolvable:$true] %s46_s15 }
   0x8   :  { %26 = dma.hbm_to_vmem [thread:$0]  %s22_s8, 128, %s24_s12, [#allocation3]  }
   0x9   :  { %s61_s17 = sshll.u32 %s692_s5, 4  ;;  %s620_s18 = smov [#allocation7]   ;;  %s62_s17 = int_to_ptr.hbm [resolvable:$true] %s61_s17 }
   0xa   :  { %s48_s19 = sshll.u32 %s620_s18, 4  ;;  %s621_s0 = smov [#allocation8]   ;;  %s49_s19 = int_to_ptr.vmem [resolvable:$true] %s48_s19 }
   0xb   :  { %54 = dma.hbm_to_vmem [thread:$0]  %s47_s15, 1024, %s49_s19, [#allocation6], %s617_s9, %s617_s9, %s618_s10  }
   0xc   :  { %s63_s20 = sshll.u32 %s621_s0, 4  ;;  %s64_s20 = int_to_ptr.vmem [resolvable:$true] %s63_s20 }
   0xd   :  { %69 = dma.hbm_to_vmem [thread:$0]  %s62_s17, 1024, %s64_s20, [#allocation9], %s617_s9, %s617_s9, %s618_s10  }
   0xe   :  { %608 = dma.done.wait [#allocation3], 128  }
   0xf   :  { %609 = vsyncadd [#allocation3], 4294967168 }
  0x10   :  { %610 = dma.done.wait [#allocation6], 2048  }
  0x11   :  { %611 = vsyncadd [#allocation6], 4294965248 }
  0x12   :  { %612 = dma.done.wait [#allocation9], 1024  }
  0x13   :  { %613 = vsyncadd [#allocation9], 4294966272  ;;  %v461_v0 = vld [vmem:[#allocation5 + $0x38] sm:$0xff]  ;;  %v460_v1 = vld [vmem:[#allocation5 + $0x30] sm:$0xff]  ;;  %s622_s24 = smov [#allocation10]   ;;  %s346_s28 = sshll.u32 %s694_s7, 4  ;;  %s347_s28 = int_to_ptr.hbm [resolvable:$true] %s346_s28 }
  0x14   :  { %158 = vmatpush.bf16.msra.mxu0 %v461_v0  ;;  %v469_v2 = vld [vmem:[#allocation7 + $0x38] sm:$0xff]  ;;  %v468_v3 = vld [vmem:[#allocation7 + $0x30] sm:$0xff]  ;;  %v459_v4 = vld [vmem:[#allocation5 + $0x28] sm:$0xff]  ;;  %s344_s25 = sshll.u32 %s622_s24, 4  ;;  %s345_s25 = int_to_ptr.vmem [resolvable:$true] %s344_s25 }
  0x15   :  { %241 = vmatpush.bf16.msra.mxu1 %v469_v2  ;;  %v467_v5 = vld [vmem:[#allocation7 + $0x28] sm:$0xff]  ;;  %v458_v6 = vld [vmem:[#allocation5 + $0x20] sm:$0xff]  ;;  %v457_v8 = vld [vmem:[#allocation5 + $0x18] sm:$0xff] }
  0x16   :  { %v466_v7 = vld [vmem:[#allocation7 + $0x20] sm:$0xff]  ;;  %v465_v9 = vld [vmem:[#allocation7 + $0x18] sm:$0xff]  ;;  %v456_v10 = vld [vmem:[#allocation5 + $0x10] sm:$0xff] }
  0x17   :  { %v464_v11 = vld [vmem:[#allocation7 + $0x10] sm:$0xff]  ;;  %v455_v12 = vld [vmem:[#allocation5 + $0x8] sm:$0xff]  ;;  %v454_v13 = vld [vmem:[#allocation5] sm:$0xff] }
  0x18   :  { %159 = vmatpush.bf16.msra.mxu0 %v460_v1  ;;  %v88_v14 = vld [vmem:[#allocation2] sm:$0xff]  ;;  %v463_v16 = vld [vmem:[#allocation7 + $0x8] sm:$0xff]  ;;  %v462_v17 = vld [vmem:[#allocation7] sm:$0xff] }
  0x19   :  { %242 = vmatpush.bf16.msra.mxu1 %v468_v3  ;;  %v106_v15 = vpack.c.bf16 %v88_v14, %v88_v14  ;;  %v477_v18 = vld [vmem:[#allocation8 + $0x38] sm:$0xff]  ;;  %v476_v19 = vld [vmem:[#allocation8 + $0x30] sm:$0xff]  ;;  %v475_v20 = vld [vmem:[#allocation8 + $0x28] sm:$0xff] }
  0x1a   :  { %324 = vmatpush.bf16.msra.mxu2 %v477_v18  ;;  %v474_v21 = vld [vmem:[#allocation8 + $0x20] sm:$0xff]  ;;  %v473_v22 = vld [vmem:[#allocation8 + $0x18] sm:$0xff]  ;;  %v472_v23 = vld [vmem:[#allocation8 + $0x10] sm:$0xff] }
  0x1b   :  { %v485_v24 = vld [vmem:[%s689_s2] ss:$0 sm:$0xff]  ;;  %v471_v30 = vld [vmem:[#allocation8 + $0x8] sm:$0xff]  ;;  %v470_v31 = vld [vmem:[#allocation8] sm:$0xff] }
  0x1c   :  { %160 = vmatpush.bf16.msra.mxu0 %v459_v4  ;;  %v486_v32 = vld [vmem:[%s691_s4] ss:$0 sm:$0xff] }
  0x1d   :  { %243 = vmatpush.bf16.msra.mxu1 %v467_v5  ;;  %v487_v38 = vld [vmem:[%s693_s6] ss:$0 sm:$0xff] }
  0x1e   :  { %325 = vmatpush.bf16.msra.mxu2 %v476_v19 }
  0x20   :  { %161 = vmatpush.bf16.msra.mxu0 %v458_v6 }
  0x21   :  { %244 = vmatpush.bf16.msra.mxu1 %v466_v7 }
  0x22   :  { %326 = vmatpush.bf16.msra.mxu2 %v475_v20 }
  0x24   :  { %162 = vmatpush.bf16.msra.mxu0 %v457_v8 }
  0x25   :  { %245 = vmatpush.bf16.msra.mxu1 %v465_v9 }
  0x26   :  { %327 = vmatpush.bf16.msra.mxu2 %v474_v21 }
  0x28   :  { %163 = vmatpush.bf16.msra.mxu0 %v456_v10 }
  0x29   :  { %246 = vmatpush.bf16.msra.mxu1 %v464_v11 }
  0x2a   :  { %328 = vmatpush.bf16.msra.mxu2 %v473_v22 }
  0x2c   :  { %164 = vmatpush.bf16.msra.mxu0 %v455_v12 }
  0x2d   :  { %247 = vmatpush.bf16.msra.mxu1 %v463_v16 }
  0x2e   :  { %329 = vmatpush.bf16.msra.mxu2 %v472_v23 }
  0x30   :  { %165 = vmatpush.bf16.msra.mxu0 %v454_v13 }
  0x31   :  { %248 = vmatpush.bf16.msra.mxu1 %v462_v17 }
  0x32   :  { %330 = vmatpush.bf16.msra.mxu2 %v471_v30 }
  0x33   :  { %166 = vmatmul.bf16.vlgmr.msra.gmra.mxu0 %v106_v15 }
  0x36   :  { %331 = vmatpush.bf16.msra.mxu2 %v470_v31 }
  0xb0   :  { %v167_v25 = vpop.f32.mrf.mxu0 }
  0xb1   :  { %v168_v26 = vadd.f32 %v485_v24, %v167_v25 }
  0xb3   :  { %v171_v27 = vmax.f32 %v168_v26, 0.0 }
  0xb5   :  { %v189_v28 = vpack.c.bf16 %v171_v27, %v171_v27 }
  0xb7   :  { %249 = vmatmul.bf16.vlgmr.msra.gmra.mxu1 %v189_v28 }
  0xb8   :  { %v169_v29 = vpop.f32.mrf.mxu0 }
 0x134   :  { %v250_v33 = vpop.f32.mrf.mxu1 }
 0x135   :  { %v251_v34 = vadd.f32 %v486_v32, %v250_v33 }
 0x137   :  { %v254_v35 = vmax.f32 %v251_v34, 0.0 }
 0x139   :  { %v272_v36 = vpack.c.bf16 %v254_v35, %v254_v35 }
 0x13b   :  { %332 = vmatmul.bf16.vlgmr.msra.gmra.mxu2 %v272_v36 }
 0x13c   :  { %v252_v37 = vpop.f32.mrf.mxu1 }
 0x1be   :  { %v333_v39 = vpop.f32.mrf.mxu2 }
 0x1bf   :  { %v334_v40 = vadd.f32 %v487_v38, %v333_v39 }
 0x1c1   :  { %v337_v41 = vmax.f32 %v334_v40, 0.0 }
 0x1c3   :  { %338 = vst [vmem:[#allocation10] sm:$0xff] %v337_v41 }
 0x1c4   :  { %349 = dma.vmem_to_hbm [thread:$0]  %s345_s25, 128, %s347_s28, [#allocation4]  }
 0x1c6   :  { %v335_v42 = vpop.f32.mrf.mxu2 }
 0x1c7   :  { %614 = dma.done.wait [#allocation4], 128  }
 0x1c8   :  { %615 = vsyncadd [#allocation4], 4294967168 }
 0x1c9   :  { %354 = vsyncpa [#allocation3], 1 }
 0x1ca   :  { %355 = vsyncpa [#allocation6], 1 }
 0x1cb   :  { %356 = vsyncpa [#allocation9], 1 }
 0x1cc   :  { %357 = vsyncpa [#allocation4], 1 }

// kernel: tpu_custom_call.1
= control target key start
LH: loop header
LB: loop body
LE: loop exit
PB: predicated region body
PF: predicated region fallthrough
CT: control target
= control target key end

     0   :  { %12 = vsyncpa [#allocation3], 0  ;;  %s687_s0 = inlined_call_operand.hbm [shape: f32[8,128], index: 0, kind: input, shape index: {}]   ;;  %s688_s1 = inlined_call_operand.hbm [shape: bf16[128,128], index: 1, kind: input, shape index: {}]   ;;  %s689_s2 = inlined_call_operand.vmem [shape: f32[1,128], index: 2, kind: input, shape index: {}]   ;;  %s690_s3 = inlined_call_operand.hbm [shape: bf16[128,128], index: 3, kind: input, shape index: {}]   ;;  %s691_s4 = inlined_call_operand.vmem [shape: f32[1,128], index: 4, kind: input, shape index: {}]   ;;  %s692_s5 = inlined_call_operand.hbm [shape: bf16[128,128], index: 5, kind: input, shape index: {}]   ;;  %s693_s6 = inlined_call_operand.vmem [shape: f32[1,128], index: 6, kind: input, shape index: {}]   ;;  %s694_s7 = inlined_call_operand.hbm [shape: f32[8,128], index: 7, kind: output, shape index: {}]  }
   0x1   :  { %13 = vsyncpa [#allocation6], 0 }
   0x2   :  { %14 = vsyncpa [#allocation9], 0  ;;  %s31_s26 = sshll.u32 %s688_s1, 4  ;;  %s32_s26 = int_to_ptr.hbm [resolvable:$true] %s31_s26 }
   0x3   :  { %15 = vsyncpa [#allocation4], 0  ;;  %s616_s27 = smov [#allocation5]   ;;  %s21_s8 = sshll.u32 %s687_s0, 4  ;;  %s22_s8 = int_to_ptr.hbm [resolvable:$true] %s21_s8 }
   0x4   :  { %s33_s28 = sshll.u32 %s616_s27, 4  ;;  %s617_s9 = smov 64   ;;  %s34_s28 = int_to_ptr.vmem [resolvable:$true] %s33_s28 }
   0x5   :  { %s618_s10 = smov 4   ;;  %s619_s11 = smov [#allocation2]  }
   0x6   :  { %39 = dma.hbm_to_vmem [thread:$0]  %s32_s26, 1024, %s34_s28, [#allocation6], %s617_s9, %s617_s9, %s618_s10  }
   0x7   :  { %s23_s12 = sshll.u32 %s619_s11, 4  ;;  %s46_s15 = sshll.u32 %s690_s3, 4  ;;  %s24_s12 = int_to_ptr.vmem [resolvable:$true] %s23_s12  ;;  %s47_s15 = int_to_ptr.hbm [resolvable:$true] %s46_s15 }
   0x8   :  { %26 = dma.hbm_to_vmem [thread:$0]  %s22_s8, 128, %s24_s12, [#allocation3]  }
   0x9   :  { %s61_s17 = sshll.u32 %s692_s5, 4  ;;  %s620_s18 = smov [#allocation7]   ;;  %s62_s17 = int_to_ptr.hbm [resolvable:$true] %s61_s17 }
   0xa   :  { %s48_s19 = sshll.u32 %s620_s18, 4  ;;  %s621_s0 = smov [#allocation8]   ;;  %s49_s19 = int_to_ptr.vmem [resolvable:$true] %s48_s19 }
   0xb   :  { %54 = dma.hbm_to_vmem [thread:$0]  %s47_s15, 1024, %s49_s19, [#allocation6], %s617_s9, %s617_s9, %s618_s10  }
   0xc   :  { %s63_s20 = sshll.u32 %s621_s0, 4  ;;  %s64_s20 = int_to_ptr.vmem [resolvable:$true] %s63_s20 }
   0xd   :  { %69 = dma.hbm_to_vmem [thread:$0]  %s62_s17, 1024, %s64_s20, [#allocation9], %s617_s9, %s617_s9, %s618_s10  }
   0xe   :  { %608 = dma.done.wait [#allocation3], 128  }
   0xf   :  { %609 = vsyncadd [#allocation3], 4294967168 }
  0x10   :  { %610 = dma.done.wait [#allocation6], 2048  }
  0x11   :  { %611 = vsyncadd [#allocation6], 4294965248 }
  0x12   :  { %612 = dma.done.wait [#allocation9], 1024  }
  0x13   :  { %613 = vsyncadd [#allocation9], 4294966272  ;;  %v461_v0 = vld [vmem:[#allocation5 + $0x38] sm:$0xff]  ;;  %v460_v1 = vld [vmem:[#allocation5 + $0x30] sm:$0xff]  ;;  %s622_s24 = smov [#allocation10]   ;;  %s346_s28 = sshll.u32 %s694_s7, 4  ;;  %s347_s28 = int_to_ptr.hbm [resolvable:$true] %s346_s28 }
  0x14   :  { %158 = vmatpush.bf16.msra.mxu0 %v461_v0  ;;  %v469_v2 = vld [vmem:[#allocation7 + $0x38] sm:$0xff]  ;;  %v468_v3 = vld [vmem:[#allocation7 + $0x30] sm:$0xff]  ;;  %v459_v4 = vld [vmem:[#allocation5 + $0x28] sm:$0xff]  ;;  %s344_s25 = sshll.u32 %s622_s24, 4  ;;  %s345_s25 = int_to_ptr.vmem [resolvable:$true] %s344_s25 }
  0x15   :  { %241 = vmatpush.bf16.msra.mxu1 %v469_v2  ;;  %v467_v5 = vld [vmem:[#allocation7 + $0x28] sm:$0xff]  ;;  %v458_v6 = vld [vmem:[#allocation5 + $0x20] sm:$0xff]  ;;  %v457_v8 = vld [vmem:[#allocation5 + $0x18] sm:$0xff] }
  0x16   :  { %v466_v7 = vld [vmem:[#allocation7 + $0x20] sm:$0xff]  ;;  %v465_v9 = vld [vmem:[#allocation7 + $0x18] sm:$0xff]  ;;  %v456_v10 = vld [vmem:[#allocation5 + $0x10] sm:$0xff] }
  0x17   :  { %v464_v11 = vld [vmem:[#allocation7 + $0x10] sm:$0xff]  ;;  %v455_v12 = vld [vmem:[#allocation5 + $0x8] sm:$0xff]  ;;  %v454_v13 = vld [vmem:[#allocation5] sm:$0xff] }
  0x18   :  { %159 = vmatpush.bf16.msra.mxu0 %v460_v1  ;;  %v88_v14 = vld [vmem:[#allocation2] sm:$0xff]  ;;  %v463_v16 = vld [vmem:[#allocation7 + $0x8] sm:$0xff]  ;;  %v462_v17 = vld [vmem:[#allocation7] sm:$0xff] }
  0x19   :  { %242 = vmatpush.bf16.msra.mxu1 %v468_v3  ;;  %v106_v15 = vpack.c.bf16 %v88_v14, %v88_v14  ;;  %v477_v18 = vld [vmem:[#allocation8 + $0x38] sm:$0xff]  ;;  %v476_v19 = vld [vmem:[#allocation8 + $0x30] sm:$0xff]  ;;  %v475_v20 = vld [vmem:[#allocation8 + $0x28] sm:$0xff] }
  0x1a   :  { %324 = vmatpush.bf16.msra.mxu2 %v477_v18  ;;  %v474_v21 = vld [vmem:[#allocation8 + $0x20] sm:$0xff]  ;;  %v473_v22 = vld [vmem:[#allocation8 + $0x18] sm:$0xff]  ;;  %v472_v23 = vld [vmem:[#allocation8 + $0x10] sm:$0xff] }
  0x1b   :  { %v485_v24 = vld [vmem:[%s689_s2] ss:$0 sm:$0xff]  ;;  %v471_v30 = vld [vmem:[#allocation8 + $0x8] sm:$0xff]  ;;  %v470_v31 = vld [vmem:[#allocation8] sm:$0xff] }
  0x1c   :  { %160 = vmatpush.bf16.msra.mxu0 %v459_v4  ;;  %v486_v32 = vld [vmem:[%s691_s4] ss:$0 sm:$0xff] }
  0x1d   :  { %243 = vmatpush.bf16.msra.mxu1 %v467_v5  ;;  %v487_v38 = vld [vmem:[%s693_s6] ss:$0 sm:$0xff] }
  0x1e   :  { %325 = vmatpush.bf16.msra.mxu2 %v476_v19 }
  0x20   :  { %161 = vmatpush.bf16.msra.mxu0 %v458_v6 }
  0x21   :  { %244 = vmatpush.bf16.msra.mxu1 %v466_v7 }
  0x22   :  { %326 = vmatpush.bf16.msra.mxu2 %v475_v20 }
  0x24   :  { %162 = vmatpush.bf16.msra.mxu0 %v457_v8 }
  0x25   :  { %245 = vmatpush.bf16.msra.mxu1 %v465_v9 }
  0x26   :  { %327 = vmatpush.bf16.msra.mxu2 %v474_v21 }
  0x28   :  { %163 = vmatpush.bf16.msra.mxu0 %v456_v10 }
  0x29   :  { %246 = vmatpush.bf16.msra.mxu1 %v464_v11 }
  0x2a   :  { %328 = vmatpush.bf16.msra.mxu2 %v473_v22 }
  0x2c   :  { %164 = vmatpush.bf16.msra.mxu0 %v455_v12 }
  0x2d   :  { %247 = vmatpush.bf16.msra.mxu1 %v463_v16 }
  0x2e   :  { %329 = vmatpush.bf16.msra.mxu2 %v472_v23 }
  0x30   :  { %165 = vmatpush.bf16.msra.mxu0 %v454_v13 }
  0x31   :  { %248 = vmatpush.bf16.msra.mxu1 %v462_v17 }
  0x32   :  { %330 = vmatpush.bf16.msra.mxu2 %v471_v30 }
  0x33   :  { %166 = vmatmul.bf16.vlgmr.msra.gmra.mxu0 %v106_v15 }
  0x36   :  { %331 = vmatpush.bf16.msra.mxu2 %v470_v31 }
  0xb0   :  { %v167_v25 = vpop.f32.mrf.mxu0 }
  0xb1   :  { %v168_v26 = vadd.f32 %v485_v24, %v167_v25 }
  0xb3   :  { %v171_v27 = vmax.f32 %v168_v26, 0.0 }
  0xb5   :  { %v189_v28 = vpack.c.bf16 %v171_v27, %v171_v27 }
  0xb7   :  { %249 = vmatmul.bf16.vlgmr.msra.gmra.mxu1 %v189_v28 }
  0xb8   :  { %v169_v29 = vpop.f32.mrf.mxu0 }
 0x134   :  { %v250_v33 = vpop.f32.mrf.mxu1 }
 0x135   :  { %v251_v34 = vadd.f32 %v486_v32, %v250_v33 }
 0x137   :  { %v254_v35 = vmax.f32 %v251_v34, 0.0 }
 0x139   :  { %v272_v36 = vpack.c.bf16 %v254_v35, %v254_v35 }
 0x13b   :  { %332 = vmatmul.bf16.vlgmr.msra.gmra.mxu2 %v272_v36 }
 0x13c   :  { %v252_v37 = vpop.f32.mrf.mxu1 }
 0x1be   :  { %v333_v39 = vpop.f32.mrf.mxu2 }
 0x1bf   :  { %v334_v40 = vadd.f32 %v487_v38, %v333_v39 }
 0x1c1   :  { %v337_v41 = vmax.f32 %v334_v40, 0.0 }
 0x1c3   :  { %338 = vst [vmem:[#allocation10] sm:$0xff] %v337_v41 }
 0x1c4   :  { %349 = dma.vmem_to_hbm [thread:$0]  %s345_s25, 128, %s347_s28, [#allocation4]  }
 0x1c6   :  { %v335_v42 = vpop.f32.mrf.mxu2 }
 0x1c7   :  { %614 = dma.done.wait [#allocation4], 128  }
 0x1c8   :  { %615 = vsyncadd [#allocation4], 4294967168 }
 0x1c9   :  { %354 = vsyncpa [#allocation3], 1 }
 0x1ca   :  { %355 = vsyncpa [#allocation6], 1 }
 0x1cb   :  { %356 = vsyncpa [#allocation9], 1 }
 0x1cc   :  { %357 = vsyncpa [#allocation4], 1 }

</bundles_post_ra>
